<compile_context>
chip_gen: v7x
topology: tpu7x:2x2x1
jax: 0.10.0
libtpu: 0.0.40
codegen_flags: <defaults>
</compile_context>

<pallas_src>
import jax
import jax.numpy as jnp
from jax.experimental import pallas as pl
from jax.experimental.pallas import tpu as pltpu


def _round_up(x, m):
    return (x + m - 1) // m * m


# ----------------------------------------------------------------------------- kernel
def helmholtz_norm_kernel(res_ref, partial_ref, acc_ref):
    # res_ref    : (2*KF, T) VMEM  flattened residual planes [res_r ; res_i],
    #                               lane-dense over samples
    # partial_ref: (1, 1)    SMEM  per-split partial sum of per-sample norms
    # acc_ref    : (1, T)    VMEM  per-lane running sum of norms (cross-lane reduce
    #                               happens only once, in the finalize step)
    j = pl.program_id(1)

    @pl.when(j == 0)
    def _init():
        acc_ref[...] = jnp.zeros_like(acc_ref)

    x = res_ref[...]                                               # (2*KF, T)
    sq = x * x                                                     # VPU
    # per-sample complex L2 norm over frequencies: sum of all 2*KF squared rows
    # (real^2 + imag^2 summed over freqs) = cheap sublane (axis-0) reduce, then sqrt.
    acc_ref[...] += jnp.sqrt(jnp.sum(sq, axis=0, keepdims=True))   # (1, T)

    @pl.when(j == pl.num_programs(1) - 1)
    def _finalize():
        # single cross-lane (XLU) reduction per split, not per step
        partial_ref[0, 0] = jnp.sum(acc_ref[...])


def helmholtz_loss_pallas(res_planes, *, n_total=None, tile_n_max=32768, num_splits=None):
    # res_planes: (2*KF, N) f32 residual planes, samples lane-dense.
    rows, n = res_planes.shape
    if n_total is None:
        n_total = n

    # Big tiles: ~80 KiB/step at the old tile_n=512 was pure per-step overhead; at
    # tile_n=32768 each block is ~3 MiB (24 padded sublanes * 32768 * 4B), 6 MiB
    # double-buffered -- comfortably inside every generation's VMEM (incl. v7x 64 MiB).
    tile_n = min(tile_n_max, _round_up(n, 128))
    tile_n = _round_up(tile_n, 128)

    n_tiles = -(-n // tile_n)
    if num_splits is None:
        # Leading "parallel" axis splits the (embarrassingly parallel) sample axis
        # across TensorCores on v7x; on single-TC chips it is just a sequential loop.
        num_splits = 2 if n_tiles >= 2 else 1
    n_tiles = _round_up(n_tiles, num_splits)
    n_padded = n_tiles * tile_n
    if n_padded != n:
        # zero-padded samples have zero residual -> zero norm -> no effect on the sum;
        # the mean divisor stays the TRUE n_total.
        res_planes = jnp.pad(res_planes, ((0, 0), (0, n_padded - n)))
    tiles_per_split = n_tiles // num_splits

    # Only raise the scoped VMEM limit if a caller requests tiles big enough to exceed
    # the v7x default (32 MiB of 64 MiB physical).
    blk_bytes = _round_up(rows, 8) * tile_n * 4
    vmem_needed = 2 * blk_bytes + tile_n * 4 + (1 << 20)
    vmem_limit = None
    if vmem_needed > (28 << 20):
        vmem_limit = min(vmem_needed + (4 << 20), 48 << 20)

    partials = pl.pallas_call(
        helmholtz_norm_kernel,
        out_shape=jax.ShapeDtypeStruct((num_splits, 1), jnp.float32),
        grid_spec=pltpu.PrefetchScalarGridSpec(
            num_scalar_prefetch=0,
            grid=(num_splits, tiles_per_split),
            in_specs=[
                pl.BlockSpec(
                    (rows, tile_n),
                    lambda s, j: (0, s * tiles_per_split + j),
                ),
            ],
            out_specs=pl.BlockSpec(
                (1, 1), lambda s, j: (s, 0), memory_space=pltpu.MemorySpace.SMEM
            ),
            scratch_shapes=[pltpu.VMEM((1, tile_n), jnp.float32)],
        ),
        compiler_params=pltpu.CompilerParams(
            dimension_semantics=("parallel", "arbitrary"),
            vmem_limit_bytes=vmem_limit,
        ),
    )(res_planes)

    # combine per-split partials and divide by the GLOBAL (unpadded) sample count
    return jnp.sum(partials) / jnp.float32(n_total)


# ------------------------------------------------------------------- glue (pure JAX)
# Deterministic analytic "model_estimation": u_f(x,y,z) = sin(a_f.xyz + p_f)
#                                                     + i * 0.5*cos(a_f.xyz + p_f)
def make_model(key, n_freq):
    ka, kp = jax.random.split(key)
    A = jax.random.normal(ka, (n_freq, 3), dtype=jnp.float32)
    phase = jax.random.normal(kp, (n_freq,), dtype=jnp.float32)

    def model_point(xyz):  # (3,) -> (u_real (F,), u_imag (F,))
        s = A @ xyz + phase
        return jnp.sin(s), 0.5 * jnp.cos(s)

    return model_point


# TODO(synk): torch.autograd.grad Laplacian chains have no Pallas equivalent; the
# Laplacian is produced with jax.hessian/vmap outside the kernel.
def laplacian_of_component(model_point, component, coords, freq_idx):
    def scalar_fn(xyz, f):
        return model_point(xyz)[component][f]

    def lap_one(xyz, f):
        H = jax.hessian(lambda p: scalar_fn(p, f))(xyz)   # (3,3)
        return jnp.trace(H)                               # u_xx + u_yy + u_zz

    return jax.vmap(lambda xyz: jax.vmap(lambda f: lap_one(xyz, f))(freq_idx))(coords)


def _residual_planes(inputs, model_point, c, omega, freq_idx):
    coords = inputs[:, :3].astype(jnp.float32)                        # (N, 3)
    u_r_all, u_i_all = jax.vmap(model_point)(coords)                  # (N, F) each
    u_r = u_r_all[:, freq_idx]                                        # (N, KF)
    u_i = u_i_all[:, freq_idx]
    lap_r = laplacian_of_component(model_point, 0, coords, freq_idx)  # (N, KF)
    lap_i = laplacian_of_component(model_point, 1, coords, freq_idx)
    ksq = ((omega[freq_idx] / c) ** 2).astype(jnp.float32)[None, :]   # (1, KF)
    # Residual assembled in the XLA glue (fuses with the Laplacian epilogue) so the
    # kernel reads half the bytes; lane-dense flat (2*KF, N) layout for the kernel.
    res_r = lap_r + ksq * u_r                                         # (N, KF)
    res_i = lap_i + ksq * u_i
    return jnp.concatenate([res_r.T, res_i.T], axis=0).astype(jnp.float32)  # (2*KF, N)


def helmholtz_loss(inputs, model_point, c, omega, freq_idx, **kernel_kwargs):
    res_planes = _residual_planes(inputs, model_point, c, omega, freq_idx)
    return helmholtz_loss_pallas(res_planes, n_total=inputs.shape[0], **kernel_kwargs)


def helmholtz_loss_ref(inputs, model_point, c, omega, freq_idx):
    # plain-JAX reference of the same math (original (N, KF) layout)
    coords = inputs[:, :3].astype(jnp.float32)
    u_r_all, u_i_all = jax.vmap(model_point)(coords)
    lap_r = laplacian_of_component(model_point, 0, coords, freq_idx)
    lap_i = laplacian_of_component(model_point, 1, coords, freq_idx)
    ksq = ((omega[freq_idx] / c) ** 2)[None, :]
    res = (lap_r + ksq * u_r_all[:, freq_idx]) + 1j * (lap_i + ksq * u_i_all[:, freq_idx])
    return jnp.mean(jnp.linalg.norm(res, axis=1))


# ---------------------------------------------------------------------------- main
if __name__ == "__main__":
    key = jax.random.PRNGKey(0)
    k_in, k_model, k_freq, k_in2 = jax.random.split(key, 4)

    N_FREQ = 16      # len(self.omega)
    KF = 10          # number of randomly sampled frequencies per forward
    C = 343.0        # wave speed

    omega = jnp.linspace(10.0, 100.0, N_FREQ, dtype=jnp.float32)
    model_point = make_model(k_model, N_FREQ)
    # TODO(synk): the PyTorch module uses unseeded `random.randint`; we sample the
    # 10 frequency indices deterministically in [1, N_FREQ-1] instead.
    freq_idx = jax.random.randint(k_freq, (KF,), 1, N_FREQ)

    # --- case 1: small N, single-block fast path (grid = (1, 1)) -------------------
    N = 128
    inputs = jax.random.uniform(k_in, (N, 3), dtype=jnp.float32, minval=-1.0, maxval=1.0)
    loss = jax.block_until_ready(helmholtz_loss(inputs, model_point, C, omega, freq_idx))
    ref = helmholtz_loss_ref(inputs, model_point, C, omega, freq_idx)
    assert jnp.allclose(loss, ref, rtol=1e-4, atol=1e-4), (loss, ref)

    # --- case 2: multi-tile + 2-way "parallel" split + zero-padding path -----------
    N2 = 384
    inputs2 = jax.random.uniform(k_in2, (N2, 3), dtype=jnp.float32, minval=-1.0, maxval=1.0)
    loss2 = jax.block_until_ready(
        helmholtz_loss(inputs2, model_point, C, omega, freq_idx, tile_n_max=128)
    )
    ref2 = helmholtz_loss_ref(inputs2, model_point, C, omega, freq_idx)
    assert jnp.allclose(loss2, ref2, rtol=1e-4, atol=1e-4), (loss2, ref2)

    print("KERNEL_OK")
</pallas_src>

<mosaic_0001>
module attributes {stable_mosaic.version = 11 : i64} {
  func.func @helmholtz_norm_kernel(%arg0: i32, %arg1: i32, %arg2: memref<20x128xf32, #tpu.memory_space<vmem>>, %arg3: memref<1x1xf32, #tpu.memory_space<smem>>, %arg4: memref<1x128xf32, #tpu.memory_space<vmem>>) attributes {dimension_semantics = [#tpu.dimension_semantics<parallel>, #tpu.dimension_semantics<arbitrary>], iteration_bounds = array<i64: 1, 1>, scalar_prefetch = 0 : i64, scratch_operands = 1 : i64, tpu.core_type = #tpu.core_type<tc>, window_params = [{transform_indices = @transform_0, window_bounds = array<i64: 20, 128>}, {transform_indices = @transform_1, window_bounds = array<i64: 1, 1>}]} {
    %c0_i32 = arith.constant 0 : i32
    %0 = arith.cmpi eq, %arg1, %c0_i32 : i32
    %1 = arith.extui %0 : i1 to i32
    %c0_i32_0 = arith.constant 0 : i32
    %2 = arith.cmpi ne, %1, %c0_i32_0 : i32
    scf.if %2 {
      %cst_8 = arith.constant 0.000000e+00 : f32
      %14 = vector.broadcast %cst_8 : f32 to vector<1x128xf32>
      %c0_9 = arith.constant 0 : index
      %c0_10 = arith.constant 0 : index
      %15 = vector.load %arg4[%c0_9, %c0_10] : memref<1x128xf32, #tpu.memory_space<vmem>>, vector<1x128xf32>
      tpu.vector_store %arg4[%c0_9, %c0_10], %14 {strides = array<i32>} : memref<1x128xf32, #tpu.memory_space<vmem>>, vector<1x128xf32>,
    } else {
    }
    %c0 = arith.constant 0 : index
    %c0_1 = arith.constant 0 : index
    %3 = vector.load %arg2[%c0, %c0_1] : memref<20x128xf32, #tpu.memory_space<vmem>>, vector<20x128xf32>
    %4 = arith.mulf %3, %3 : vector<20x128xf32>
    %c0_2 = arith.constant 0 : index
    %c0_3 = arith.constant 0 : index
    %5 = vector.load %arg4[%c0_2, %c0_3] : memref<1x128xf32, #tpu.memory_space<vmem>>, vector<1x128xf32>
    %cst = arith.constant dense<0.000000e+00> : vector<128xf32>
    %6 = vector.multi_reduction <add>, %4, %cst [0] : vector<20x128xf32> to vector<128xf32>
    %7 = vector.shape_cast %6 : vector<128xf32> to vector<1x128xf32>
    %8 = math.sqrt %7 : vector<1x128xf32>
    %9 = arith.addf %5, %8 : vector<1x128xf32>
    %c0_4 = arith.constant 0 : index
    %c0_5 = arith.constant 0 : index
    %10 = vector.load %arg4[%c0_4, %c0_5] : memref<1x128xf32, #tpu.memory_space<vmem>>, vector<1x128xf32>
    tpu.vector_store %arg4[%c0_4, %c0_5], %9 {strides = array<i32>} : memref<1x128xf32, #tpu.memory_space<vmem>>, vector<1x128xf32>,
    %c0_i32_6 = arith.constant 0 : i32
    %11 = arith.cmpi eq, %arg1, %c0_i32_6 : i32
    %12 = arith.extui %11 : i1 to i32
    %c0_i32_7 = arith.constant 0 : i32
    %13 = arith.cmpi ne, %12, %c0_i32_7 : i32
    scf.if %13 {
      %c0_8 = arith.constant 0 : index
      %c0_9 = arith.constant 0 : index
      %14 = vector.load %arg4[%c0_8, %c0_9] : memref<1x128xf32, #tpu.memory_space<vmem>>, vector<1x128xf32>
      %15 = vector.shape_cast %14 : vector<1x128xf32> to vector<1x1x128xf32>
      %cst_10 = arith.constant dense<0.000000e+00> : vector<1xf32>
      %16 = vector.multi_reduction <add>, %15, %cst_10 [1, 2] : vector<1x1x128xf32> to vector<1xf32>
      %17 = vector.shape_cast %16 : vector<1xf32> to vector<1x1x1xf32>
      %18 = vector.extract %17[0, 0, 0] : f32 from vector<1x1x1xf32>
      %c0_11 = arith.constant 0 : index
      %c0_12 = arith.constant 0 : index
      %19 = memref.load %arg3[%c0_11, %c0_12] : memref<1x1xf32, #tpu.memory_space<smem>>
      memref.store %18, %arg3[%c0_11, %c0_12] : memref<1x1xf32, #tpu.memory_space<smem>>
    } else {
    }
    return
  }
  func.func @transform_0(%arg0: i32, %arg1: i32) -> (i32, i32) {
    %c1_i32 = arith.constant 1 : i32
    %0 = arith.muli %arg0, %c1_i32 : i32
    %1 = arith.addi %0, %arg1 : i32
    %c0_i32 = arith.constant 0 : i32
    %c0_i32_0 = arith.constant 0 : i32
    return %c0_i32, %1 : i32, i32
  }
  func.func @transform_1(%arg0: i32, %arg1: i32) -> (i32, i32) {
    %c0_i32 = arith.constant 0 : i32
    %c0_i32_0 = arith.constant 0 : i32
    return %arg0, %c0_i32 : i32, i32
  }
}

</mosaic_0001>

<bundles_post_ra>
// kernel: tpu_custom_call.1
= control target key start
LH: loop header
LB: loop body
LE: loop exit
PB: predicated region body
PF: predicated region fallthrough
CT: control target
= control target key end

     0   :  { %6 = vsyncpa [#allocation4], 0  ;;  %s173_s0 = inlined_call_operand.hbm [shape: f32[20,128], index: 0, kind: input, shape index: {}]   ;;  %s174_s1 = inlined_call_operand.hbm [shape: f32[1,1], index: 1, kind: output, shape index: {}]  }
   0x1   :  { %7 = vsyncpa [#allocation5], 0  ;;  %s134_s6 = smov [#allocation3]   ;;  %s98_s10 = scalar_lea.hbm %s173_s0, 384 }
   0x2   :  { %s16_s7 = sshll.u32 %s134_s6, 4  ;;  %p99_p0 = scmp.ne.s32.totalorder %s173_s0, %s98_s10  ;;  %s17_s7 = int_to_ptr.vmem [resolvable:$true] %s16_s7 }
   0x3   :  { %p102_p1 = scmp.lt.u32.totalorder %s98_s10, %s173_s0 }
   0x5   :  { %p104_p2 = pnand %p102_p1, %p99_p0 }
   0x7   :  { %107 = shalt.err (!%p104_p2)
}
   0x8   :  { %s108_s15 = scalar_lea.vmem %s17_s7, 384  ;;  %p113_p4 = scmp.lt.s32.totalorder %s17_s7, %s17_s7 }
   0x9   :  { %p109_p3 = scmp.ne.s32.totalorder %s17_s7, %s108_s15  ;;  %p114_p5 = scmp.lt.s32.totalorder %s108_s15, %s108_s15 }
   0xb   :  { %p115_p6 = por %p114_p5, %p113_p4 }
   0xd   :  { %p116_p7 = pnand %p115_p6, %p109_p3 }
   0xf   :  { %119 = shalt.err (!%p116_p7)
}
  0x10   :  { %s135_s16 = smov 128   ;;  %s136_s17 = smov 8  }
  0x11   :  { %22 = dma.hbm_to_vmem [thread:$0]  %s173_s0, 384, %s17_s7, [#allocation4], %s135_s16, %s135_s16, %s136_s17  }
  0x12   :  { %130 = dma.done.wait [#allocation4], 384  }
  0x13   :  { %131 = vsyncadd [#allocation4], 4294966912  ;;  %v137_v0 = vmov 0.0   ;;  %v32_v1 = vld [vmem:[#allocation3] sm:$0xff]  ;;  %v33_v2 = vld [vmem:[#allocation3 + $0x8] sm:$0xff]  ;;  %vm40_vm0 = vcmask 1043456  }
  0x14   :  { %31 = vst [vmem:[#allocation2] sm:$0x1] %v137_v0  ;;  %v34_v3 = vld [vmem:[#allocation3 + $0x10] sm:$0xf]  ;;  %v35_v4 = vmul.f32 %v32_v1, %v32_v1  ;;  %v36_v5 = vmul.f32 %v33_v2, %v33_v2  ;;  %vm62_vm3 = vcmask 1040384   ;;  %s120_s22 = scalar_lea.hbm %s174_s1, 16 }
  0x15   :  { %v37_v6 = vmul.f32 %v34_v3, %v34_v3  ;;  %p121_p8 = scmp.ne.s32.totalorder %s174_s1, %s120_s22  ;;  %p124_p9 = scmp.lt.u32.totalorder %s120_s22, %s174_s1 }
  0x16   :  { %v39_v7 = vadd.f32 %v36_v5, %v35_v4 }
  0x17   :  { %v41_v8 = vsel %vm40_vm0, %v37_v6, 0.0  ;;  %p126_p10 = pnand %p124_p9, %p121_p8 }
  0x18   :  { %v42_v9 = vadd.f32 %v41_v8, %v39_v7 }
  0x1a   :  { %v43_v10 = vrot.slane %v42_v9, 4 }
  0x1b   :  { %v38_v19 = vld [vmem:[#allocation2] sm:$0x1] }
  0x1c   :  { %v44_v11 = vadd.f32 %v43_v10, %v42_v9 }
  0x1e   :  { %v45_v12 = vrot.slane %v44_v11, 2 }
  0x20   :  { %v46_v13 = vadd.f32 %v45_v12, %v44_v11 }
  0x22   :  { %v47_v14 = vrot.slane %v46_v13, 1 }
  0x24   :  { %v48_v15 = vadd.f32 %v47_v14, %v46_v13 }
  0x26   :  { %96 = vrsqrt.f32 %v48_v15  ;;  %vm51_vm1 = vcmp.eq.f32.partialorder %v48_v15, inf  ;;  %v54_v17 = vand.u32 2147483648, %v48_v15  ;;  %vm53_vm2 = vcmp.eq.f32.partialorder %v48_v15, 0.0 }
  0x30   :  { %v97_v16 = vpop.eup %96 }
  0x31   :  { %v50_v18 = vmul.f32 %v97_v16, %v48_v15 }
  0x33   :  { %v52_v20 = vsel %vm51_vm1, %v48_v15, %v50_v18 }
  0x34   :  { %v55_v21 = vsel %vm53_vm2, %v54_v17, %v52_v20 }
  0x35   :  { %v56_v22 = vadd.f32 %v55_v21, %v38_v19 }
  0x37   :  { %57 = vst [vmem:[#allocation2] sm:$0x1] %v56_v22 }
  0x3e   :  { %v61_v23 = vld [vmem:[#allocation2] sm:$0x1] }
  0x3f   :  { %v63_v24 = vsel %vm62_vm3, %v61_v23, 0.0 }
  0x40   :  { %64 = vadd.xlane.f32.xlu0 %v63_v24 }
  0xcd   :  { %v65_v25 = vpop.xlane.xlu0 %64 }
  0xce   :  { %v66_v26 = vrot.slane %v65_v25, 4 }
  0xd0   :  { %v67_v27 = vadd.f32 %v66_v26, %v65_v25 }
  0xd2   :  { %v68_v28 = vrot.slane %v67_v27, 2 }
  0xd4   :  { %v69_v29 = vadd.f32 %v68_v28, %v67_v27 }
  0xd6   :  { %v70_v30 = vrot.slane %v69_v29, 1 }
  0xd8   :  { %v71_v31 = vadd.f32 %v70_v30, %v69_v29 }
  0xda   :  { %89 = vpush %v71_v31 }
 0x10b   :  { %s90_s0 = spop %89 }
 0x10c   :  { %74 = sst [smem:[#allocation6]] %s90_s0 }
 0x10d   :  { %129 = shalt.err (!%p126_p10)
}
 0x10e   :  { %s138_s27 = smov [#allocation6]  }
 0x10f   :  { %82 = dma.smem_to_hbm %s138_s27, 16, %s174_s1, [#allocation5]  }
 0x110   :  { %132 = dma.done.wait [#allocation5], 16  }
 0x111   :  { %133 = vsyncadd [#allocation5], 4294967280 }
 0x112   :  { %86 = sfence }
 0x113   :  { %87 = vsyncpa [#allocation4], 1 }
 0x114   :  { %88 = vsyncpa [#allocation5], 1 }

</bundles_post_ra>
